<compile_context>
chip_gen: v6e
topology: v6e:2x2x1
jax: 0.10.0
libtpu: 0.0.40
codegen_flags: <defaults>
</compile_context>

<pallas_src>
import jax
import jax.numpy as jnp
from jax.experimental import pallas as pl
from jax.experimental.pallas import tpu as pltpu


def _edge_kernel(a_ref, b_ref, out_ref):
    """One grid step: TB images, single separable Sobel on d = a - b, partial sum out.

    a_ref, b_ref : (TB, H, W) tiles in VMEM (native input dtype)
    out_ref      : (1, 1, 1) f32 partial sum for this grid step
    """
    a = a_ref[...].astype(jnp.float32)
    b = b_ref[...].astype(jnp.float32)
    d = a - b                                   # (TB, H, W)
    TB, H, W = d.shape

    zc = jnp.zeros((TB, H, 1), jnp.float32)     # zero padding column
    zr = jnp.zeros((TB, 1, W), jnp.float32)     # zero padding row

    # Horizontal (lane-axis) pass; the zero strip is the conv's zero padding.
    d_w = jnp.concatenate([zc, d[:, :, : W - 1]], axis=2)   # d[.., j-1]
    d_e = jnp.concatenate([d[:, :, 1:], zc], axis=2)        # d[.., j+1]
    hd = d_w - d_e                                           # [1, 0, -1]
    hs = d_w + 2.0 * d + d_e                                 # [1, 2, 1]

    # Vertical (sublane-axis) pass.
    hd_n = jnp.concatenate([zr, hd[:, : H - 1, :]], axis=1)  # hd[.., i-1, :]
    hd_s = jnp.concatenate([hd[:, 1:, :], zr], axis=1)       # hd[.., i+1, :]
    hs_n = jnp.concatenate([zr, hs[:, : H - 1, :]], axis=1)
    hs_s = jnp.concatenate([hs[:, 1:, :], zr], axis=1)

    gx = hd_n + 2.0 * hd + hd_s          # Sobel-x response of d (zero padded)
    gy = hs_n - hs_s                     # Sobel-y response of d (zero padded)

    s = jnp.sum(jnp.abs(gx) + jnp.abs(gy))          # single full-tile reduction
    out_ref[...] = jnp.zeros(out_ref.shape, out_ref.dtype) + s


def _vmem_params():
    """Returns (per-input block budget, vmem limit, physical VMEM) in bytes."""
    try:
        phys = int(pltpu.get_tpu_info().vmem_capacity_bytes)
    except Exception:
        phys = 64 << 20            # conservative fallback: v7x physical VMEM / TC
    if phys >= (100 << 20):        # v5e / v6e: 128 MiB physical VMEM
        return 4 << 20, 96 << 20, phys
    return 2 << 20, 48 << 20, phys  # v7x: 64 MiB physical VMEM


def _edge_partial_sum(a, b, tb, grid, vmem_limit):
    """Sum of |gx|+|gy| over the first grid*tb images of a, b (shape (n, H, W))."""
    _, H, W = a.shape
    partials = pl.pallas_call(
        _edge_kernel,
        out_shape=jax.ShapeDtypeStruct((grid, 1, 1), jnp.float32),
        grid=(grid,),
        in_specs=[
            pl.BlockSpec((tb, H, W), lambda n: (n, 0, 0)),
            pl.BlockSpec((tb, H, W), lambda n: (n, 0, 0)),
        ],
        # Independent per-step partials -> batch axis runs "parallel"
        # (shards across both TensorCores on v7x; neutral on v5e/v6e).
        out_specs=pl.BlockSpec((1, 1, 1), lambda n: (n, 0, 0)),
        compiler_params=pltpu.CompilerParams(
            dimension_semantics=("parallel",),
            vmem_limit_bytes=int(vmem_limit),
        ),
    )(a, b)
    return jnp.sum(partials)


def edge_loss(img1, img2, *, block_budget_bytes=None):
    """img1, img2: (N, 1, H, W) float images (NCHW, single channel). Returns scalar mean."""
    N, C, H, W = img1.shape
    assert C == 1, "EDGE uses a (1,1,3,3) conv weight -> single input channel"
    assert H >= 2 and W >= 2, "EDGE Pallas kernel assumes spatial dims >= 2"

    # Metadata-only channel squeeze; inputs stay in their native dtype (HBM saving
    # for bf16/f16 inputs -- the kernel casts to f32 right after the load).
    a = img1.reshape(N, H, W)
    b = img2.reshape(N, H, W)

    budget, vmem_limit, vmem_phys = _vmem_params()
    if block_budget_bytes is not None:
        budget = int(block_budget_bytes)

    itemsize = jnp.dtype(img1.dtype).itemsize
    bytes_per_img = H * W * itemsize
    cap = max(1, budget // bytes_per_img)
    tb = min(N, cap)
    # Prefer >= 4 grid steps (2 v7x TensorCores x double-buffered DMA) as long as
    # the block stays >= 512 KiB.
    if N >= 4 and pl.cdiv(N, tb) < 4:
        tb_small = max(1, N // 4)
        if tb_small * bytes_per_img >= (512 << 10):
            tb = tb_small

    # Make sure the VMEM limit covers 2 inputs x 2 pipeline buffers + f32
    # temporaries even when a single image exceeds the nominal budget (tb == 1).
    in_block = tb * bytes_per_img
    f32_block = tb * H * W * 4
    needed = 4 * in_block + 8 * f32_block + (2 << 20)
    vmem_limit = min(max(vmem_limit, needed), vmem_phys - (8 << 20))
    # TODO(synk): single images whose working set exceeds VMEM (e.g. 2048x2048 f32 on
    # v7x's 64 MiB) need H-tiling with a 1-row halo (extra halo-row input streams);
    # not implemented here.

    n_main = (N // tb) * tb
    rem = N - n_main
    denom = float(N) * C * H * W           # torch.mean over (N, 1, H, W)

    total = jnp.float32(0.0)
    if n_main > 0:
        # Grid covers only the first n_main images of the full arrays (no host slice
        # of the bulk -> no extra HBM copy).
        total = total + _edge_partial_sum(a, b, tb, n_main // tb, vmem_limit)
    if rem > 0:
        # Tiny remainder handled by a second call with its own (small) tile; the
        # host-side slice copies at most tb-1 images.
        total = total + _edge_partial_sum(a[n_main:], b[n_main:], rem, 1, vmem_limit)
    return total / denom


def _edge_loss_ref(img1, img2):
    """Pure-JAX reference (padded shift-based conv) for a correctness check."""
    def sobel(x):  # x: (N, H, W), zero padding=1
        p = jnp.pad(x.astype(jnp.float32), ((0, 0), (1, 1), (1, 1)))
        H, W = x.shape[1], x.shape[2]
        gx = (p[:, 0:H, 0:W] - p[:, 0:H, 2:W + 2]
              + 2.0 * p[:, 1:H + 1, 0:W] - 2.0 * p[:, 1:H + 1, 2:W + 2]
              + p[:, 2:H + 2, 0:W] - p[:, 2:H + 2, 2:W + 2])
        gy = (p[:, 0:H, 0:W] + 2.0 * p[:, 0:H, 1:W + 1] + p[:, 0:H, 2:W + 2]
              - p[:, 2:H + 2, 0:W] - 2.0 * p[:, 2:H + 2, 1:W + 1] - p[:, 2:H + 2, 2:W + 2])
        return gx, gy

    g1x, g1y = sobel(img1[:, 0])
    g2x, g2y = sobel(img2[:, 0])
    return jnp.mean(jnp.abs(g1x - g2x) + jnp.abs(g1y - g2y))


if __name__ == "__main__":
    key = jax.random.PRNGKey(0)
    k1, k2, k3, k4 = jax.random.split(key, 4)

    # Case 1: small even batch (single grid step), jitted as in production.
    img1 = jax.random.normal(k1, (2, 1, 16, 16), dtype=jnp.float32)
    img2 = jax.random.normal(k2, (2, 1, 16, 16), dtype=jnp.float32)
    out = jax.block_until_ready(jax.jit(edge_loss)(img1, img2))
    ref = _edge_loss_ref(img1, img2)
    assert jnp.allclose(out, ref, rtol=1e-4, atol=1e-5), (out, ref)

    # Case 2: batch that does not divide the tile, with a tiny forced block budget
    # so the bulk (tb=2, grid=2) + remainder (tb=1) path is exercised.
    img3 = jax.random.normal(k3, (5, 1, 16, 16), dtype=jnp.float32)
    img4 = jax.random.normal(k4, (5, 1, 16, 16), dtype=jnp.float32)
    out2 = jax.block_until_ready(edge_loss(img3, img4, block_budget_bytes=2048))
    ref2 = _edge_loss_ref(img3, img4)
    assert jnp.allclose(out2, ref2, rtol=1e-4, atol=1e-5), (out2, ref2)

    print("KERNEL_OK")
</pallas_src>

<mosaic_0001>
module attributes {stable_mosaic.version = 11 : i64} {
  func.func @_edge_kernel(%arg0: i32, %arg1: memref<2x16x16xf32, #tpu.memory_space<vmem>>, %arg2: memref<2x16x16xf32, #tpu.memory_space<vmem>>, %arg3: memref<1x1x1xf32, #tpu.memory_space<vmem>>) attributes {dimension_semantics = [#tpu.dimension_semantics<parallel>], iteration_bounds = array<i64: 1>, scalar_prefetch = 0 : i64, scratch_operands = 0 : i64, tpu.core_type = #tpu.core_type<tc>, window_params = [{transform_indices = @transform_0, window_bounds = array<i64: 2, 16, 16>}, {transform_indices = @transform_1, window_bounds = array<i64: 2, 16, 16>}, {transform_indices = @transform_2, window_bounds = array<i64: 1, 1, 1>}]} {
    %c0 = arith.constant 0 : index
    %c0_0 = arith.constant 0 : index
    %c0_1 = arith.constant 0 : index
    %0 = vector.load %arg1[%c0, %c0_0, %c0_1] : memref<2x16x16xf32, #tpu.memory_space<vmem>>, vector<2x16x16xf32>
    %c0_2 = arith.constant 0 : index
    %c0_3 = arith.constant 0 : index
    %c0_4 = arith.constant 0 : index
    %1 = vector.load %arg2[%c0_2, %c0_3, %c0_4] : memref<2x16x16xf32, #tpu.memory_space<vmem>>, vector<2x16x16xf32>
    %2 = arith.subf %0, %1 : vector<2x16x16xf32>
    %cst = arith.constant 0.000000e+00 : f32
    %3 = vector.broadcast %cst : f32 to vector<2x16x1xf32>
    %cst_5 = arith.constant 0.000000e+00 : f32
    %4 = vector.broadcast %cst_5 : f32 to vector<2x1x16xf32>
    %5 = vector.extract_strided_slice %2 {offsets = [0, 0, 0], sizes = [2, 16, 15], strides = [1, 1, 1]} : vector<2x16x16xf32> to vector<2x16x15xf32>
    %6 = tpu.concatenate %3, %5 in 2 : vector<2x16x1xf32>, vector<2x16x15xf32> -> vector<2x16x16xf32>
    %7 = vector.extract_strided_slice %2 {offsets = [0, 0, 1], sizes = [2, 16, 15], strides = [1, 1, 1]} : vector<2x16x16xf32> to vector<2x16x15xf32>
    %8 = tpu.concatenate %7, %3 in 2 : vector<2x16x15xf32>, vector<2x16x1xf32> -> vector<2x16x16xf32>
    %9 = arith.subf %6, %8 : vector<2x16x16xf32>
    %cst_6 = arith.constant 2.000000e+00 : f32
    %10 = vector.broadcast %cst_6 : f32 to vector<2x16x16xf32>
    %11 = arith.mulf %10, %2 : vector<2x16x16xf32>
    %12 = arith.addf %6, %11 : vector<2x16x16xf32>
    %13 = arith.addf %12, %8 : vector<2x16x16xf32>
    %14 = vector.extract_strided_slice %9 {offsets = [0, 0, 0], sizes = [2, 15, 16], strides = [1, 1, 1]} : vector<2x16x16xf32> to vector<2x15x16xf32>
    %15 = tpu.concatenate %4, %14 in 1 : vector<2x1x16xf32>, vector<2x15x16xf32> -> vector<2x16x16xf32>
    %16 = vector.extract_strided_slice %9 {offsets = [0, 1, 0], sizes = [2, 15, 16], strides = [1, 1, 1]} : vector<2x16x16xf32> to vector<2x15x16xf32>
    %17 = tpu.concatenate %16, %4 in 1 : vector<2x15x16xf32>, vector<2x1x16xf32> -> vector<2x16x16xf32>
    %18 = vector.extract_strided_slice %13 {offsets = [0, 0, 0], sizes = [2, 15, 16], strides = [1, 1, 1]} : vector<2x16x16xf32> to vector<2x15x16xf32>
    %19 = tpu.concatenate %4, %18 in 1 : vector<2x1x16xf32>, vector<2x15x16xf32> -> vector<2x16x16xf32>
    %20 = vector.extract_strided_slice %13 {offsets = [0, 1, 0], sizes = [2, 15, 16], strides = [1, 1, 1]} : vector<2x16x16xf32> to vector<2x15x16xf32>
    %21 = tpu.concatenate %20, %4 in 1 : vector<2x15x16xf32>, vector<2x1x16xf32> -> vector<2x16x16xf32>
    %cst_7 = arith.constant 2.000000e+00 : f32
    %22 = vector.broadcast %cst_7 : f32 to vector<2x16x16xf32>
    %23 = arith.mulf %22, %9 : vector<2x16x16xf32>
    %24 = arith.addf %15, %23 : vector<2x16x16xf32>
    %25 = arith.addf %24, %17 : vector<2x16x16xf32>
    %26 = arith.subf %19, %21 : vector<2x16x16xf32>
    %27 = math.absf %25 : vector<2x16x16xf32>
    %28 = math.absf %26 : vector<2x16x16xf32>
    %29 = arith.addf %27, %28 : vector<2x16x16xf32>
    %30 = vector.shape_cast %29 : vector<2x16x16xf32> to vector<1x2x16x16xf32>
    %cst_8 = arith.constant dense<0.000000e+00> : vector<1xf32>
    %31 = vector.multi_reduction <add>, %30, %cst_8 [1, 2, 3] : vector<1x2x16x16xf32> to vector<1xf32>
    %32 = vector.shape_cast %31 : vector<1xf32> to vector<1x1x1x1xf32>
    %33 = vector.extract %32[0, 0, 0, 0] : f32 from vector<1x1x1x1xf32>
    %cst_9 = arith.constant 0.000000e+00 : f32
    %34 = vector.broadcast %cst_9 : f32 to vector<1x1x1xf32>
    %35 = vector.broadcast %33 : f32 to vector<1x1x1xf32>
    %36 = arith.addf %34, %35 : vector<1x1x1xf32>
    %c0_10 = arith.constant 0 : index
    %c0_11 = arith.constant 0 : index
    %c0_12 = arith.constant 0 : index
    %37 = vector.load %arg3[%c0_10, %c0_11, %c0_12] : memref<1x1x1xf32, #tpu.memory_space<vmem>>, vector<1x1x1xf32>
    tpu.vector_store %arg3[%c0_10, %c0_11, %c0_12], %36 {strides = array<i32>} : memref<1x1x1xf32, #tpu.memory_space<vmem>>, vector<1x1x1xf32>,
    return
  }
  func.func @transform_0(%arg0: i32) -> (i32, i32, i32) {
    %c0_i32 = arith.constant 0 : i32
    %c0_i32_0 = arith.constant 0 : i32
    %c0_i32_1 = arith.constant 0 : i32
    return %arg0, %c0_i32, %c0_i32_0 : i32, i32, i32
  }
  func.func @transform_1(%arg0: i32) -> (i32, i32, i32) {
    %c0_i32 = arith.constant 0 : i32
    %c0_i32_0 = arith.constant 0 : i32
    %c0_i32_1 = arith.constant 0 : i32
    return %arg0, %c0_i32, %c0_i32_0 : i32, i32, i32
  }
  func.func @transform_2(%arg0: i32) -> (i32, i32, i32) {
    %c0_i32 = arith.constant 0 : i32
    %c0_i32_0 = arith.constant 0 : i32
    %c0_i32_1 = arith.constant 0 : i32
    return %arg0, %c0_i32, %c0_i32_0 : i32, i32, i32
  }
}

</mosaic_0001>

<bundles_post_ra>
// kernel: edge_loss.1
= control target key start
LH: loop header
LB: loop body
LE: loop exit
PB: predicated region body
PF: predicated region fallthrough
CT: control target
= control target key end

     0   :  { %7 = vsyncpa [#allocation3], 0  ;;  %s363_s0 = inlined_call_operand.hbm [shape: f32[2,16,16], index: 0, kind: input, shape index: {}]   ;;  %s364_s1 = inlined_call_operand.hbm [shape: f32[2,16,16], index: 1, kind: input, shape index: {}]   ;;  %s365_s2 = inlined_call_operand.hbm [shape: f32[1,1,1], index: 2, kind: output, shape index: {}]  }
   0x1   :  { %8 = vsyncpa [#allocation6], 0 }
   0x2   :  { %9 = vsyncpa [#allocation4], 0  ;;  %s304_s9 = smov [#allocation2]  }
   0x3   :  { %s15_s10 = sshll.u32 %s304_s9, 4  ;;  %s16_s10 = int_to_ptr.vmem [resolvable:$true] %s15_s10 }
   0x4   :  { %s246_s11 = scalar_lea.vmem %s16_s10, 512  ;;  %p251_p1 = scmp.lt.s32.totalorder %s16_s10, %s16_s10 }
   0x5   :  { %p247_p0 = scmp.ne.s32.totalorder %s16_s10, %s246_s11  ;;  %p252_p2 = scmp.lt.s32.totalorder %s246_s11, %s246_s11 }
   0x7   :  { %p253_p3 = por %p252_p2, %p251_p1 }
   0x9   :  { %p254_p4 = pnand %p253_p3, %p247_p0 }
   0xb   :  { %257 = shalt.err (!%p254_p4)
}
   0xc   :  { %s305_s12 = smov 128   ;;  %s306_s13 = smov 8  }
   0xd   :  { %21 = dma.hbm_to_vmem [thread:$0]  %s363_s0, 512, %s16_s10, [#allocation3], %s305_s12, %s305_s12, %s306_s13  }
   0xe   :  { %s307_s16 = smov [#allocation5]  }
   0xf   :  { %s27_s17 = sshll.u32 %s307_s16, 4  ;;  %s28_s17 = int_to_ptr.vmem [resolvable:$true] %s27_s17 }
  0x10   :  { %s266_s18 = scalar_lea.vmem %s28_s17, 512  ;;  %p271_p6 = scmp.lt.s32.totalorder %s28_s17, %s28_s17 }
  0x11   :  { %p267_p5 = scmp.ne.s32.totalorder %s28_s17, %s266_s18  ;;  %p272_p7 = scmp.lt.s32.totalorder %s266_s18, %s266_s18 }
  0x13   :  { %p273_p8 = por %p272_p7, %p271_p6 }
  0x15   :  { %p274_p9 = pnand %p273_p8, %p267_p5 }
  0x17   :  { %277 = shalt.err (!%p274_p9)
}
  0x18   :  { %33 = dma.hbm_to_vmem [thread:$0]  %s364_s1, 512, %s28_s17, [#allocation6], %s305_s12, %s305_s12, %s306_s13  }
  0x19   :  { %298 = dma.done.wait [#allocation3], 512  }
  0x1a   :  { %299 = vsyncadd [#allocation3], 4294966784 }
  0x1b   :  { %300 = dma.done.wait [#allocation6], 512  }
  0x1c   :  { %301 = vsyncadd [#allocation6], 4294966784  ;;  %v40_v0 = vld [vmem:[#allocation2] sm:$0xff]  ;;  %v41_v2 = vld [vmem:[#allocation2 + $0x8] sm:$0xff]  ;;  %s308_s0 = smov 127   ;;  %s309_s21 = smov 1  }
  0x1d   :  { %v44_v1 = vld [vmem:[#allocation5] sm:$0xff]  ;;  %v45_v4 = vld [vmem:[#allocation5 + $0x8] sm:$0xff]  ;;  %v43_v6 = vld [vmem:[#allocation2 + $0x18] sm:$0xff]  ;;  %vm85_vm0 = vcmask 121856   ;;  %vm68_vm1 = vcmask 7168   ;;  %vm110_vm2 = vcmask 1040384  }
  0x1e   :  { %v48_v3 = vsub.f32 %v40_v0, %v44_v1  ;;  %v49_v5 = vsub.f32 %v41_v2, %v45_v4  ;;  %v47_v7 = vld [vmem:[#allocation5 + $0x18] sm:$0xff]  ;;  %v42_v8 = vld [vmem:[#allocation2 + $0x10] sm:$0xff]  ;;  %vm123_vm3 = vcmask 1046528   ;;  %vm192_vm4 = vcmask 130048   ;;  %s310_s1 = smov [#allocation7]  }
  0x1f   :  { %v46_v9 = vld [vmem:[#allocation5 + $0x10] sm:$0xff]  ;;  %v51_v10 = vsub.f32 %v43_v6, %v47_v7  ;;  %s219_s22 = sshll.u32 %s310_s1, 4  ;;  %vm211_vm5 = vcmask 0   ;;  %s220_s22 = int_to_ptr.vmem [resolvable:$true] %s219_s22 }
  0x20   :  { %73 = vrot.lane.b32.xlu1 %v48_v3, %s308_s0  ;;  %56 = vrot.lane.b32.xlu0 %v48_v3, %s309_s21  ;;  %v50_v11 = vsub.f32 %v42_v8, %v46_v9  ;;  %v94_v12 = vmul.f32 2.0, %v48_v3  ;;  %v95_v19 = vmul.f32 2.0, %v49_v5  ;;  %s278_s24 = scalar_lea.vmem %s220_s22, 16  ;;  %s282_s25 = scalar_lea.vmem %s220_s22, 32 }
  0x21   :  { %v97_v28 = vmul.f32 2.0, %v51_v10  ;;  %p279_p10 = scmp.ne.s32.totalorder %s220_s22, %s278_s24  ;;  %p283_p11 = scmp.lt.s32.totalorder %s220_s22, %s220_s22 }
  0x22   :  { %v96_v32 = vmul.f32 2.0, %v50_v11  ;;  %p284_p12 = scmp.lt.s32.totalorder %s282_s25, %s278_s24 }
  0x24   :  { %75 = vrot.lane.b32.xlu1 %v49_v5, %s308_s0  ;;  %58 = vrot.lane.b32.xlu0 %v49_v5, %s309_s21  ;;  %p285_p13 = por %p284_p12, %p283_p11 }
  0x26   :  { %p286_p0 = pnand %p285_p13, %p279_p10 }
  0x28   :  { %62 = vrot.lane.b32.xlu1 %v51_v10, %s309_s21  ;;  %60 = vrot.lane.b32.xlu0 %v50_v11, %s309_s21 }
  0x2c   :  { %79 = vrot.lane.b32.xlu1 %v51_v10, %s308_s0  ;;  %77 = vrot.lane.b32.xlu0 %v50_v11, %s308_s0 }
  0x92   :  { %v74_v13 = vpop.permute.xlu1 %73  ;;  %v57_v14 = vpop.permute.xlu0 %56 }
  0x93   :  { %v86_v15 = vsel %vm85_vm0, %v74_v13, 0.0  ;;  %v69_v16 = vsel %vm68_vm1, 0.0, %v57_v14 }
  0x94   :  { %v90_v17 = vsub.f32 %v69_v16, %v86_v15  ;;  %v98_v18 = vadd.f32 %v94_v12, %v69_v16 }
  0x96   :  { %v102_v20 = vadd.f32 %v98_v18, %v86_v15  ;;  %v111_v21 = vrot.slane %v90_v17, 7  ;;  %v76_v22 = vpop.permute.xlu1 %75  ;;  %v59_v23 = vpop.permute.xlu0 %58  ;;  %v164_v26 = vmul.f32 2.0, %v90_v17  ;;  %v124_v30 = vrot.slane %v90_v17, 1 }
  0x97   :  { %v87_v24 = vsel %vm85_vm0, %v76_v22, 0.0  ;;  %v70_v25 = vsel %vm68_vm1, 0.0, %v59_v23 }
  0x98   :  { %v91_v27 = vsub.f32 %v70_v25, %v87_v24  ;;  %v121_v29 = vsel %vm110_vm2, 0.0, %v111_v21  ;;  %v99_v31 = vadd.f32 %v95_v19, %v70_v25  ;;  %v140_v33 = vrot.slane %v102_v20, 7 }
  0x99   :  { %v152_v42 = vrot.slane %v102_v20, 1  ;;  %v168_v43 = vadd.f32 %v164_v26, %v121_v29 }
  0x9a   :  { %v112_v34 = vrot.slane %v91_v27, 7  ;;  %v125_v35 = vrot.slane %v91_v27, 1  ;;  %v165_v36 = vmul.f32 2.0, %v91_v27  ;;  %v63_v37 = vpop.permute.xlu1 %62  ;;  %v61_v38 = vpop.permute.xlu0 %60  ;;  %v103_v39 = vadd.f32 %v99_v31, %v87_v24 }
  0x9b   :  { %v72_v40 = vsel %vm68_vm1, 0.0, %v63_v37  ;;  %v71_v41 = vsel %vm68_vm1, 0.0, %v61_v38  ;;  %v150_v50 = vsel %vm110_vm2, 0.0, %v140_v33 }
  0x9c   :  { %v113_v44 = vsel %vm110_vm2, %v111_v21, %v112_v34  ;;  %v126_v45 = vsel %vm123_vm3, %v124_v30, %v125_v35  ;;  %v141_v46 = vrot.slane %v103_v39, 7  ;;  %v153_v47 = vrot.slane %v103_v39, 1 }
  0x9d   :  { %v169_v48 = vadd.f32 %v165_v36, %v113_v44  ;;  %v101_v49 = vadd.f32 %v97_v28, %v72_v40  ;;  %v134_v51 = vsel %vm123_vm3, %v125_v35, 0.0  ;;  %v100_v52 = vadd.f32 %v96_v32, %v71_v41 }
  0x9e   :  { %v80_v53 = vpop.permute.xlu1 %79  ;;  %v78_v54 = vpop.permute.xlu0 %77  ;;  %v172_v55 = vadd.f32 %v168_v43, %v126_v45  ;;  %v142_v56 = vsel %vm110_vm2, %v140_v33, %v141_v46  ;;  %v154_v57 = vsel %vm123_vm3, %v152_v42, %v153_v47  ;;  %v162_v58 = vsel %vm123_vm3, %v153_v47, 0.0 }
  0x9f   :  { %v173_v59 = vadd.f32 %v169_v48, %v134_v51  ;;  %v177_v60 = vsub.f32 %v142_v56, %v162_v58  ;;  %v89_v61 = vsel %vm85_vm0, %v80_v53, 0.0  ;;  %v88_v62 = vsel %vm85_vm0, %v78_v54, 0.0 }
  0xa0   :  { %v176_v63 = vsub.f32 %v150_v50, %v154_v57  ;;  %v93_v1 = vsub.f32 %v72_v40, %v89_v61  ;;  %v105_v2 = vadd.f32 %v101_v49, %v89_v61  ;;  %v92_v3 = vsub.f32 %v71_v41, %v88_v62 }
  0xa1   :  { %v181_v0 = vand.u32 2147483647, %v173_v59  ;;  %v185_v4 = vand.u32 2147483647, %v177_v60  ;;  %v104_v5 = vadd.f32 %v100_v52, %v88_v62  ;;  %v180_v6 = vand.u32 2147483647, %v172_v55 }
  0xa2   :  { %v184_v7 = vand.u32 2147483647, %v176_v63  ;;  %v115_v8 = vrot.slane %v93_v1, 7  ;;  %v128_v9 = vrot.slane %v93_v1, 1  ;;  %v144_v10 = vrot.slane %v105_v2, 7 }
  0xa3   :  { %v156_v11 = vrot.slane %v105_v2, 1  ;;  %v167_v12 = vmul.f32 2.0, %v93_v1  ;;  %v114_v13 = vrot.slane %v92_v3, 7  ;;  %v127_v14 = vrot.slane %v92_v3, 1 }
  0xa4   :  { %v143_v15 = vrot.slane %v104_v5, 7  ;;  %v155_v17 = vrot.slane %v104_v5, 1  ;;  %v166_v18 = vmul.f32 2.0, %v92_v3  ;;  %v135_v19 = vsel %vm123_vm3, %v128_v9, 0.0 }
  0xa5   :  { %v163_v16 = vsel %vm123_vm3, %v156_v11, 0.0  ;;  %v122_v20 = vsel %vm110_vm2, 0.0, %v114_v13  ;;  %v116_v22 = vsel %vm110_vm2, %v114_v13, %v115_v8  ;;  %v129_v23 = vsel %vm123_vm3, %v127_v14, %v128_v9 }
  0xa6   :  { %v151_v21 = vsel %vm110_vm2, 0.0, %v143_v15  ;;  %v157_v24 = vsel %vm123_vm3, %v155_v17, %v156_v11  ;;  %v170_v25 = vadd.f32 %v166_v18, %v122_v20  ;;  %v145_v26 = vsel %vm110_vm2, %v143_v15, %v144_v10 }
  0xa7   :  { %v171_v27 = vadd.f32 %v167_v12, %v116_v22  ;;  %v178_v28 = vsub.f32 %v151_v21, %v157_v24  ;;  %v179_v29 = vsub.f32 %v145_v26, %v163_v16  ;;  %v188_v30 = vadd.f32 %v184_v7, %v180_v6 }
  0xa8   :  { %v189_v31 = vadd.f32 %v185_v4, %v181_v0  ;;  %v174_v32 = vadd.f32 %v170_v25, %v129_v23 }
  0xa9   :  { %v175_v33 = vadd.f32 %v171_v27, %v135_v19  ;;  %v186_v34 = vand.u32 2147483647, %v178_v28  ;;  %v193_v35 = vsel %vm192_vm4, %v188_v30, 0.0  ;;  %v187_v39 = vand.u32 2147483647, %v179_v29 }
  0xaa   :  { %v194_v36 = vsel %vm192_vm4, %v189_v31, 0.0  ;;  %v182_v37 = vand.u32 2147483647, %v174_v32 }
  0xab   :  { %v183_v38 = vand.u32 2147483647, %v175_v33  ;;  %v195_v40 = vadd.f32 %v194_v36, %v193_v35 }
  0xac   :  { %v190_v41 = vadd.f32 %v186_v34, %v182_v37 }
  0xad   :  { %v191_v42 = vadd.f32 %v187_v39, %v183_v38 }
  0xae   :  { %v196_v43 = vsel %vm192_vm4, %v190_v41, 0.0 }
  0xaf   :  { %v197_v44 = vadd.f32 %v196_v43, %v195_v40  ;;  %v198_v45 = vsel %vm192_vm4, %v191_v42, 0.0 }
  0xb1   :  { %v199_v46 = vadd.f32 %v198_v45, %v197_v44 }
  0xb3   :  { %200 = vadd.xlane.f32.xlu0 %v199_v46 }
 0x13c   :  { %v201_v47 = vpop.xlane.xlu0 %200 }
 0x13d   :  { %v202_v48 = vrot.slane %v201_v47, 4 }
 0x13f   :  { %v203_v49 = vadd.f32 %v202_v48, %v201_v47 }
 0x141   :  { %v204_v50 = vrot.slane %v203_v49, 2 }
 0x143   :  { %v205_v51 = vadd.f32 %v204_v50, %v203_v49 }
 0x145   :  { %v206_v52 = vrot.slane %v205_v51, 1 }
 0x147   :  { %v207_v53 = vadd.f32 %v206_v52, %v205_v51 }
 0x149   :  { %229 = vpush %v207_v53 }
 0x17a   :  { %s230_s23 = spop %229 }
 0x17b   :  { %v209_v54 = vstv %s230_s23 }
 0x17c   :  { %212 = vst.msk [vmem:[#allocation7] sm:$0x1] %vm211_vm5, %v209_v54 }
 0x17d   :  { %289 = shalt.err (!%p286_p0)
}
 0x17e   :  { %222 = dma.vmem_to_hbm [thread:$0]  %s220_s22, 16, %s365_s2, [#allocation4]  }
 0x17f   :  { %302 = dma.done.wait [#allocation4], 16  }
 0x180   :  { %303 = vsyncadd [#allocation4], 4294967280 }
 0x181   :  { %226 = vsyncpa [#allocation3], 1 }
 0x182   :  { %227 = vsyncpa [#allocation6], 1 }
 0x183   :  { %228 = vsyncpa [#allocation4], 1 }

</bundles_post_ra>
